<compile_context>
chip_gen: v7x
topology: tpu7x:2x2x1
jax: 0.10.0
libtpu: 0.0.40
codegen_flags: <defaults>
</compile_context>

<pallas_src>
import jax
import jax.numpy as jnp
from jax.experimental import pallas as pl
from jax.experimental.pallas import tpu as pltpu


def _round_up(n, m):
    return ((n + m - 1) // m) * m


def _net_kernel(x_ref, w1_ref, b1_ref, w2_ref, b2_ref,
                w3_ref, b3_ref, w4_ref, b4_ref, y_ref):
    # x tile is (F, TILE) bf16: already (K, N) for the MXU, batch on lanes.
    x = x_ref[...]

    # Layer 1: (32, F) @ (F, tile) -> (32, tile), f32 accumulate.
    h = jnp.dot(w1_ref[...], x, preferred_element_type=jnp.float32)
    h = jnp.maximum(h + b1_ref[...], 0.0)
    # F.dropout(p=0.1, training=False) -> identity.

    # Layer 2: (32, 32) @ (32, tile) -> (32, tile); bf16 MXU inputs, f32 acc.
    h = jnp.dot(w2_ref[...], h.astype(jnp.bfloat16),
                preferred_element_type=jnp.float32)
    h = jnp.maximum(h + b2_ref[...], 0.0)

    # Layer 3
    h = jnp.dot(w3_ref[...], h.astype(jnp.bfloat16),
                preferred_element_type=jnp.float32)
    h = jnp.maximum(h + b3_ref[...], 0.0)

    # Layer 4 (M=1, K=32): keep it off the MXU -- broadcast FMA on the VPU,
    # cross-sublane reduction on the XLU.  w4_ref is (32, 1) f32.
    y = jnp.sum(w4_ref[...] * h, axis=0, keepdims=True) + b4_ref[...]
    y_ref[...] = y.astype(y_ref.dtype)      # (1, tile) lane-dense store


def _batch_dim_semantics(num_tiles):
    """CORE_PARALLEL on v7x (2 TCs/chip) when there is >1 tile; else 'parallel'."""
    try:
        kind = jax.devices()[0].device_kind.lower()
        if "v7" in kind and num_tiles >= 2 and hasattr(pltpu, "CORE_PARALLEL"):
            return (pltpu.CORE_PARALLEL,)
    except Exception:
        pass
    return ("parallel",)


def net_forward(x, params, *, tile_n=16384):
    """x: [N, input_shape + s_shape] float32. Returns [N, 1] float32."""
    (w1, b1), (w2, b2), (w3, b3), (w4, b4) = params
    n, f = x.shape

    # Pad the batch to a lane-friendly multiple of the tile size.
    n_pad = max(_round_up(n, 128), 128)
    tile = min(tile_n, n_pad)
    n_pad = _round_up(n_pad, tile)

    # Lane-dense (F, N_pad) layout + bf16: halves DMA bytes, no in-kernel
    # relayout, ~16x smaller x blocks than the old (tile, F) layout.
    xt = jnp.pad(x, ((0, n_pad - n), (0, 0))).T.astype(jnp.bfloat16)

    # bf16 MXU weights for layers 1-3; layer 4 stays f32 (VPU path).
    w1b, w2b, w3b = (w.astype(jnp.bfloat16) for w in (w1, w2, w3))
    # Biases as f32 columns so they broadcast over the lane (batch) axis.
    b1c, b2c, b3c = (b.reshape(-1, 1) for b in (b1, b2, b3))
    w4c = w4.reshape(-1, 1)          # (32, 1) f32
    b4c = b4.reshape(1, 1)           # (1, 1)  f32

    grid = (n_pad // tile,)
    const = lambda a: pl.BlockSpec(a.shape, lambda i: (0, 0))

    y_t = pl.pallas_call(
        _net_kernel,
        out_shape=jax.ShapeDtypeStruct((1, n_pad), jnp.float32),
        grid=grid,
        in_specs=[pl.BlockSpec((f, tile), lambda i: (0, i)),   # x: pipelined tiles
                  const(w1b), const(b1c),
                  const(w2b), const(b2c),
                  const(w3b), const(b3c),
                  const(w4c), const(b4c)],
        out_specs=pl.BlockSpec((1, tile), lambda i: (0, i)),   # lane-dense output
        compiler_params=pltpu.CompilerParams(
            dimension_semantics=_batch_dim_semantics(grid[0]),
            vmem_limit_bytes=48 * 1024 * 1024),
    )(xt, w1b, b1c, w2b, b2c, w3b, b3c, w4c, b4c)

    return y_t[0, :n].reshape(n, 1)


def init_params(key, input_shape, s_shape=2):
    """Deterministic init matching the nn.Linear shapes in Net.__init__."""
    d_in = input_shape + s_shape
    dims = [(32, d_in), (32, 32), (32, 32), (1, 32)]
    params = []
    for i, (out_f, in_f) in enumerate(dims):
        kw, kb = jax.random.split(jax.random.fold_in(key, i))
        bound = 1.0 / (in_f ** 0.5)  # PyTorch default uniform(-1/sqrt(fan_in), ...)
        w = jax.random.uniform(kw, (out_f, in_f), jnp.float32, -bound, bound)
        b = jax.random.uniform(kb, (out_f,), jnp.float32, -bound, bound)
        params.append((w, b))
    return params


def _reference(x, params):
    (w1, b1), (w2, b2), (w3, b3), (w4, b4) = params
    h = jnp.maximum(x @ w1.T + b1, 0.0)
    h = jnp.maximum(h @ w2.T + b2, 0.0)
    h = jnp.maximum(h @ w3.T + b3, 0.0)
    return h @ w4.T + b4


if __name__ == "__main__":
    key = jax.random.PRNGKey(0)
    input_shape, s_shape = 6, 2            # feature dim = 8
    k_x1, k_x2, k_x3, k_p = jax.random.split(key, 4)
    params = init_params(k_p, input_shape, s_shape)

    # (batch, key, tile_n) cases:
    #  * 8   -> padded to a single 128-wide tile
    #  * 200 -> non-aligned batch, pad + slice-back correctness
    #  * 300 with tile_n=128 -> multi-tile grid (exercises the pipelined path)
    cases = ((8, k_x1, 16384), (200, k_x2, 16384), (300, k_x3, 128))
    for batch, kk, tn in cases:
        x = jax.random.normal(kk, (batch, input_shape + s_shape), jnp.float32)
        y = net_forward(x, params, tile_n=tn)
        jax.block_until_ready(y)

        y_ref = _reference(x, params)
        assert y.shape == (batch, 1)
        # bf16 MXU inputs (f32 accumulate) -> relaxed tolerance vs f32 reference.
        assert jnp.allclose(y, y_ref, rtol=2e-2, atol=2e-2), \
            f"mismatch vs reference (batch={batch})"

    print("KERNEL_OK")
</pallas_src>

<mosaic_0001>
module attributes {stable_mosaic.version = 11 : i64} {
  func.func @_net_kernel(%arg0: i32, %arg1: memref<8x128xbf16, #tpu.memory_space<vmem>>, %arg2: memref<32x8xbf16, #tpu.memory_space<vmem>>, %arg3: memref<32x1xf32, #tpu.memory_space<vmem>>, %arg4: memref<32x32xbf16, #tpu.memory_space<vmem>>, %arg5: memref<32x1xf32, #tpu.memory_space<vmem>>, %arg6: memref<32x32xbf16, #tpu.memory_space<vmem>>, %arg7: memref<32x1xf32, #tpu.memory_space<vmem>>, %arg8: memref<32x1xf32, #tpu.memory_space<vmem>>, %arg9: memref<1x1xf32, #tpu.memory_space<vmem>>, %arg10: memref<1x128xf32, #tpu.memory_space<vmem>>) attributes {dimension_semantics = [#tpu.dimension_semantics<parallel>], iteration_bounds = array<i64: 1>, scalar_prefetch = 0 : i64, scratch_operands = 0 : i64, tpu.core_type = #tpu.core_type<tc>, window_params = [{transform_indices = @transform_0, window_bounds = array<i64: 8, 128>}, {pipeline_mode = #tpu.pipeline_mode<synchronous>, transform_indices = @transform_1, window_bounds = array<i64: 32, 8>}, {pipeline_mode = #tpu.pipeline_mode<synchronous>, transform_indices = @transform_2, window_bounds = array<i64: 32, 1>}, {pipeline_mode = #tpu.pipeline_mode<synchronous>, transform_indices = @transform_3, window_bounds = array<i64: 32, 32>}, {pipeline_mode = #tpu.pipeline_mode<synchronous>, transform_indices = @transform_4, window_bounds = array<i64: 32, 1>}, {pipeline_mode = #tpu.pipeline_mode<synchronous>, transform_indices = @transform_5, window_bounds = array<i64: 32, 32>}, {pipeline_mode = #tpu.pipeline_mode<synchronous>, transform_indices = @transform_6, window_bounds = array<i64: 32, 1>}, {pipeline_mode = #tpu.pipeline_mode<synchronous>, transform_indices = @transform_7, window_bounds = array<i64: 32, 1>}, {pipeline_mode = #tpu.pipeline_mode<synchronous>, transform_indices = @transform_8, window_bounds = array<i64: 1, 1>}, {transform_indices = @transform_9, window_bounds = array<i64: 1, 128>}]} {
    %c0 = arith.constant 0 : index
    %c0_0 = arith.constant 0 : index
    %0 = vector.load %arg1[%c0, %c0_0] : memref<8x128xbf16, #tpu.memory_space<vmem>>, vector<8x128xbf16>
    %c0_1 = arith.constant 0 : index
    %c0_2 = arith.constant 0 : index
    %1 = vector.load %arg2[%c0_1, %c0_2] : memref<32x8xbf16, #tpu.memory_space<vmem>>, vector<32x8xbf16>
    %cst = arith.constant dense<0.000000e+00> : vector<32x128xf32>
    %2 = tpu.matmul %1, %0, %cst {dimension_numbers = #tpu.dot_dimension_numbers<[1], [0], [0], [1], [0, 0, 1, 1], [], []>} : vector<32x8xbf16>, vector<8x128xbf16>, vector<32x128xf32> -> vector<32x128xf32>
    %c0_3 = arith.constant 0 : index
    %c0_4 = arith.constant 0 : index
    %3 = vector.load %arg3[%c0_3, %c0_4] : memref<32x1xf32, #tpu.memory_space<vmem>>, vector<32x1xf32>
    %4 = vector.broadcast %3 : vector<32x1xf32> to vector<32x128xf32>
    %5 = arith.addf %2, %4 : vector<32x128xf32>
    %cst_5 = arith.constant 0.000000e+00 : f32
    %6 = vector.broadcast %cst_5 : f32 to vector<32x128xf32>
    %7 = arith.maximumf %5, %6 : vector<32x128xf32>
    %c0_6 = arith.constant 0 : index
    %c0_7 = arith.constant 0 : index
    %8 = vector.load %arg4[%c0_6, %c0_7] : memref<32x32xbf16, #tpu.memory_space<vmem>>, vector<32x32xbf16>
    %9 = arith.truncf %7 : vector<32x128xf32> to vector<32x128xbf16>
    %cst_8 = arith.constant dense<0.000000e+00> : vector<32x128xf32>
    %10 = tpu.matmul %8, %9, %cst_8 {dimension_numbers = #tpu.dot_dimension_numbers<[1], [0], [0], [1], [0, 0, 1, 1], [], []>} : vector<32x32xbf16>, vector<32x128xbf16>, vector<32x128xf32> -> vector<32x128xf32>
    %c0_9 = arith.constant 0 : index
    %c0_10 = arith.constant 0 : index
    %11 = vector.load %arg5[%c0_9, %c0_10] : memref<32x1xf32, #tpu.memory_space<vmem>>, vector<32x1xf32>
    %12 = vector.broadcast %11 : vector<32x1xf32> to vector<32x128xf32>
    %13 = arith.addf %10, %12 : vector<32x128xf32>
    %cst_11 = arith.constant 0.000000e+00 : f32
    %14 = vector.broadcast %cst_11 : f32 to vector<32x128xf32>
    %15 = arith.maximumf %13, %14 : vector<32x128xf32>
    %c0_12 = arith.constant 0 : index
    %c0_13 = arith.constant 0 : index
    %16 = vector.load %arg6[%c0_12, %c0_13] : memref<32x32xbf16, #tpu.memory_space<vmem>>, vector<32x32xbf16>
    %17 = arith.truncf %15 : vector<32x128xf32> to vector<32x128xbf16>
    %cst_14 = arith.constant dense<0.000000e+00> : vector<32x128xf32>
    %18 = tpu.matmul %16, %17, %cst_14 {dimension_numbers = #tpu.dot_dimension_numbers<[1], [0], [0], [1], [0, 0, 1, 1], [], []>} : vector<32x32xbf16>, vector<32x128xbf16>, vector<32x128xf32> -> vector<32x128xf32>
    %c0_15 = arith.constant 0 : index
    %c0_16 = arith.constant 0 : index
    %19 = vector.load %arg7[%c0_15, %c0_16] : memref<32x1xf32, #tpu.memory_space<vmem>>, vector<32x1xf32>
    %20 = vector.broadcast %19 : vector<32x1xf32> to vector<32x128xf32>
    %21 = arith.addf %18, %20 : vector<32x128xf32>
    %cst_17 = arith.constant 0.000000e+00 : f32
    %22 = vector.broadcast %cst_17 : f32 to vector<32x128xf32>
    %23 = arith.maximumf %21, %22 : vector<32x128xf32>
    %c0_18 = arith.constant 0 : index
    %c0_19 = arith.constant 0 : index
    %24 = vector.load %arg8[%c0_18, %c0_19] : memref<32x1xf32, #tpu.memory_space<vmem>>, vector<32x1xf32>
    %25 = vector.broadcast %24 : vector<32x1xf32> to vector<32x128xf32>
    %26 = arith.mulf %25, %23 : vector<32x128xf32>
    %cst_20 = arith.constant dense<0.000000e+00> : vector<128xf32>
    %27 = vector.multi_reduction <add>, %26, %cst_20 [0] : vector<32x128xf32> to vector<128xf32>
    %28 = vector.shape_cast %27 : vector<128xf32> to vector<1x128xf32>
    %c0_21 = arith.constant 0 : index
    %c0_22 = arith.constant 0 : index
    %29 = vector.load %arg9[%c0_21, %c0_22] : memref<1x1xf32, #tpu.memory_space<vmem>>, vector<1x1xf32>
    %30 = vector.broadcast %29 : vector<1x1xf32> to vector<1x128xf32>
    %31 = arith.addf %28, %30 : vector<1x128xf32>
    %c0_23 = arith.constant 0 : index
    %c0_24 = arith.constant 0 : index
    %32 = vector.load %arg10[%c0_23, %c0_24] : memref<1x128xf32, #tpu.memory_space<vmem>>, vector<1x128xf32>
    tpu.vector_store %arg10[%c0_23, %c0_24], %31 {strides = array<i32>} : memref<1x128xf32, #tpu.memory_space<vmem>>, vector<1x128xf32>,
    return
  }
  func.func @transform_0(%arg0: i32) -> (i32, i32) {
    %c0_i32 = arith.constant 0 : i32
    %c0_i32_0 = arith.constant 0 : i32
    return %c0_i32, %arg0 : i32, i32
  }
  func.func @transform_1(%arg0: i32) -> (i32, i32) {
    %c0_i32 = arith.constant 0 : i32
    %c0_i32_0 = arith.constant 0 : i32
    %c0_i32_1 = arith.constant 0 : i32
    return %c0_i32, %c0_i32_0 : i32, i32
  }
  func.func @transform_2(%arg0: i32) -> (i32, i32) {
    %c0_i32 = arith.constant 0 : i32
    %c0_i32_0 = arith.constant 0 : i32
    %c0_i32_1 = arith.constant 0 : i32
    return %c0_i32, %c0_i32_0 : i32, i32
  }
  func.func @transform_3(%arg0: i32) -> (i32, i32) {
    %c0_i32 = arith.constant 0 : i32
    %c0_i32_0 = arith.constant 0 : i32
    %c0_i32_1 = arith.constant 0 : i32
    return %c0_i32, %c0_i32_0 : i32, i32
  }
  func.func @transform_4(%arg0: i32) -> (i32, i32) {
    %c0_i32 = arith.constant 0 : i32
    %c0_i32_0 = arith.constant 0 : i32
    %c0_i32_1 = arith.constant 0 : i32
    return %c0_i32, %c0_i32_0 : i32, i32
  }
  func.func @transform_5(%arg0: i32) -> (i32, i32) {
    %c0_i32 = arith.constant 0 : i32
    %c0_i32_0 = arith.constant 0 : i32
    %c0_i32_1 = arith.constant 0 : i32
    return %c0_i32, %c0_i32_0 : i32, i32
  }
  func.func @transform_6(%arg0: i32) -> (i32, i32) {
    %c0_i32 = arith.constant 0 : i32
    %c0_i32_0 = arith.constant 0 : i32
    %c0_i32_1 = arith.constant 0 : i32
    return %c0_i32, %c0_i32_0 : i32, i32
  }
  func.func @transform_7(%arg0: i32) -> (i32, i32) {
    %c0_i32 = arith.constant 0 : i32
    %c0_i32_0 = arith.constant 0 : i32
    %c0_i32_1 = arith.constant 0 : i32
    return %c0_i32, %c0_i32_0 : i32, i32
  }
  func.func @transform_8(%arg0: i32) -> (i32, i32) {
    %c0_i32 = arith.constant 0 : i32
    %c0_i32_0 = arith.constant 0 : i32
    %c0_i32_1 = arith.constant 0 : i32
    return %c0_i32, %c0_i32_0 : i32, i32
  }
  func.func @transform_9(%arg0: i32) -> (i32, i32) {
    %c0_i32 = arith.constant 0 : i32
    %c0_i32_0 = arith.constant 0 : i32
    return %c0_i32, %arg0 : i32, i32
  }
}

</mosaic_0001>

<bundles_post_ra>
// kernel: tpu_custom_call.1
= control target key start
LH: loop header
LB: loop body
LE: loop exit
PB: predicated region body
PF: predicated region fallthrough
CT: control target
= control target key end

     0   :  { %s621_s0 = inlined_call_operand.vmem [shape: bf16[8,128], index: 0, kind: input, shape index: {}]   ;;  %s622_s1 = inlined_call_operand.vmem [shape: bf16[32,8], index: 1, kind: input, shape index: {}]   ;;  %s623_s2 = inlined_call_operand.vmem [shape: f32[32,1], index: 2, kind: input, shape index: {}]   ;;  %s624_s3 = inlined_call_operand.vmem [shape: bf16[32,32], index: 3, kind: input, shape index: {}]   ;;  %s625_s4 = inlined_call_operand.vmem [shape: f32[32,1], index: 4, kind: input, shape index: {}]   ;;  %s626_s5 = inlined_call_operand.vmem [shape: bf16[32,32], index: 5, kind: input, shape index: {}]   ;;  %s627_s6 = inlined_call_operand.vmem [shape: f32[32,1], index: 6, kind: input, shape index: {}]   ;;  %s628_s7 = inlined_call_operand.vmem [shape: f32[32,1], index: 7, kind: input, shape index: {}]   ;;  %s629_s8 = inlined_call_operand.<no memory space> [shape: f32[1,1], index: 8, kind: input, shape index: {}]   ;;  %s630_s9 = inlined_call_operand.hbm [shape: f32[1,128], index: 9, kind: output, shape index: {}]  }
   0x1   :  { %v14_v0 = vstv %s629_s8 }
   0x2   :  { %15 = vst [vmem:[#allocation2] sm:$0x1] %v14_v0 }
   0x3   :  { %v36_v1 = vld [vmem:[%s621_s0] sm:$0xf]  ;;  %vm82_vm0 = vcmask 1043456   ;;  %vm75_vm1 = vcmask 64512   ;;  %v452_v4 = vld [vmem:[%s622_s1 + $0x8] sm:$0xff]   ;;  %v481_v6 = vmov 0  }
   0x4   :  { %v451_v2 = vld [vmem:[%s622_s1] sm:$0xff]   ;;  %446 = vmatprep.subr.msk.bf16.mxu0 %vm82_vm0, %v36_v1  ;;  %v84_v3 = vsel %vm82_vm0, %v36_v1, 0  ;;  %449 = vset.pattern.permute.xlu0 %v481_v6  ;;  %v43_v7 = vld [vmem:[%s623_s2 + $0x10] sm:$0xff]  ;;  %v42_v8 = vld [vmem:[%s623_s2 + $0x8] sm:$0xff] }
   0x5   :  { %425 = vmatpush3.bf16.msra.mxu0 %v84_v3  ;;  %426 = vmatprep.mubr.msk.bf16.mxu0 %vm75_vm1, %v451_v2  ;;  %v41_v5 = vld [vmem:[%s623_s2] sm:$0xff]  ;;  %v44_v9 = vld [vmem:[%s623_s2 + $0x18] sm:$0xff]  ;;  %v146_v11 = vld [vmem:[%s625_s4 + $0x8] sm:$0xff] }
   0x6   :  { %450 = vset.pattern.permute.xlu1 %v481_v6  ;;  %47 = vperm.xlu0 %449, %v41_v5   ;;  %v145_v10 = vld [vmem:[%s625_s4] sm:$0xff] }
   0x7   :  { %57 = vperm.xlu1 %450, %v43_v7  }
   0x8   :  { %427 = vmatmul.mubr.msk.bf16.vlgmr.msra.gmra.mrb[0].mxu0 %vm75_vm1, %v452_v4 }
   0xa   :  { %52 = vperm.xlu0 %449, %v42_v8  }
   0xb   :  { %62 = vperm.xlu1 %450, %v44_v9  }
   0xc   :  { %16 = vsyncpa [#allocation4], 0  ;;  %v147_v12 = vld [vmem:[%s625_s4 + $0x10] sm:$0xff]  ;;  %v148_v13 = vld [vmem:[%s625_s4 + $0x18] sm:$0xff]  ;;  %vm179_vm2 = vcmask 261120  }
   0xd   :  { %v245_v14 = vld [vmem:[%s627_s6] sm:$0xff]  ;;  %v246_v15 = vld [vmem:[%s627_s6 + $0x8] sm:$0xff]  ;;  %v247_v16 = vld [vmem:[%s627_s6 + $0x10] sm:$0xff] }
   0xe   :  { %151 = vperm.xlu0 %449, %v145_v10   ;;  %v248_v17 = vld [vmem:[%s627_s6 + $0x18] sm:$0xff]  ;;  %v338_v18 = vld [vmem:[%s628_s7] sm:$0xff]  ;;  %v339_v19 = vld [vmem:[%s628_s7 + $0x8] sm:$0xff] }
   0xf   :  { %156 = vperm.xlu1 %450, %v146_v11   ;;  %v340_v20 = vld [vmem:[%s628_s7 + $0x10] sm:$0xff]  ;;  %v341_v21 = vld [vmem:[%s628_s7 + $0x18] sm:$0xff]  ;;  %v375_v22 = vld [vmem:[#allocation2] sm:$0x1] }
  0x10   :  { %v453_v23 = vld [vmem:[%s624_s3] sm:$0xff]   ;;  %v454_v42 = vld [vmem:[%s624_s3 + $0x8] sm:$0xff]  }
  0x11   :  { %434 = vmatprep.mubr.msk.bf16.mxu1 %vm179_vm2, %v453_v23  ;;  %v455_v43 = vld [vmem:[%s626_s5] sm:$0xff]   ;;  %v456_v62 = vld [vmem:[%s626_s5 + $0x8] sm:$0xff]   ;;  %s482_s5 = smov [#allocation3]  }
  0x12   :  { %161 = vperm.xlu0 %449, %v147_v12   ;;  %442 = vmatprep.mubr.msk.bf16.mxu0 %vm179_vm2, %v455_v43  ;;  %s393_s25 = sshll.u32 %s482_s5, 4  ;;  %s394_s25 = int_to_ptr.vmem [resolvable:$true] %s393_s25 }
  0x13   :  { %166 = vperm.xlu1 %450, %v148_v13   ;;  %s457_s26 = scalar_lea.vmem %s394_s25, 16  ;;  %s461_s27 = scalar_lea.vmem %s394_s25, 32 }
  0x14   :  { %p458_p0 = scmp.ne.s32.totalorder %s394_s25, %s457_s26  ;;  %p462_p1 = scmp.lt.s32.totalorder %s394_s25, %s394_s25 }
  0x15   :  { %p463_p2 = scmp.lt.s32.totalorder %s461_s27, %s457_s26 }
  0x16   :  { %251 = vperm.xlu0 %449, %v245_v14  }
  0x17   :  { %256 = vperm.xlu1 %450, %v246_v15   ;;  %p464_p3 = por %p463_p2, %p462_p1 }
  0x19   :  { %p465_p4 = pnand %p464_p3, %p458_p0 }
  0x1a   :  { %261 = vperm.xlu0 %449, %v247_v16  }
  0x1b   :  { %266 = vperm.xlu1 %450, %v248_v17  }
  0x1e   :  { %344 = vperm.xlu0 %449, %v338_v18  }
  0x1f   :  { %349 = vperm.xlu1 %450, %v339_v19  }
  0x22   :  { %354 = vperm.xlu0 %449, %v340_v20  }
  0x23   :  { %359 = vperm.xlu1 %450, %v341_v21  }
  0x26   :  { %378 = vperm.xlu0 %449, %v375_v22  }
  0x85   :  { %v48_v25 = vpop.permute.xlu0 %47 }
  0x86   :  { %v58_v24 = vpop.permute.xlu1 %57 }
  0x89   :  { %v53_v32 = vpop.permute.xlu0 %52 }
  0x8a   :  { %v63_v29 = vpop.permute.xlu1 %62 }
  0x8d   :  { %v152_v44 = vpop.permute.xlu0 %151 }
  0x8e   :  { %v157_v45 = vpop.permute.xlu1 %156 }
  0x91   :  { %v162_v46 = vpop.permute.xlu0 %161 }
  0x92   :  { %v167_v50 = vpop.permute.xlu1 %166 }
  0x95   :  { %v252_v63 = vpop.permute.xlu0 %251 }
  0x96   :  { %v257_v0 = vpop.permute.xlu1 %256 }
  0x99   :  { %v262_v1 = vpop.permute.xlu0 %261 }
  0x9a   :  { %v267_v2 = vpop.permute.xlu1 %266 }
  0x9d   :  { %v345_v8 = vpop.permute.xlu0 %344 }
  0x9e   :  { %v350_v13 = vpop.permute.xlu1 %349 }
  0xa1   :  { %v355_v19 = vpop.permute.xlu0 %354 }
  0xa2   :  { %v360_v22 = vpop.permute.xlu1 %359 }
  0xdb   :  { %v428_v26 = vpop.f32.mrb[0].mxu0 }
  0xdc   :  { %v129_v27 = vadd.f32 %v428_v26, %v58_v24  ;;  %v120_v28 = vpop.f32.mrb[1].mxu0 }
  0xdd   :  { %v121_v30 = vadd.f32 %v120_v28, %v48_v25  ;;  %v429_v31 = vpop.f32.mrb[2].mxu0  ;;  %v381_v25 = vlaneseq }
  0xde   :  { %v132_v33 = vadd.f32 %v429_v31, %v63_v29  ;;  %v123_v34 = vpop.f32.mrb[3].mxu0  ;;  %v137_v36 = vmax.f32 %v129_v27, 0.0 }
  0xdf   :  { %v124_v35 = vadd.f32 %v123_v34, %v53_v32  ;;  %v135_v38 = vmax.f32 %v121_v30, 0.0  ;;  %v382_v28 = vshrl.u32 %v381_v25, 7 }
  0xe0   :  { %v138_v37 = vmax.f32 %v132_v33, 0.0  ;;  %v379_v33 = vpop.permute.xlu0 %378 }
  0xe1   :  { %v136_v39 = vmax.f32 %v124_v35, 0.0  ;;  %v383_v31 = vsub.s32 0, %v382_v28 }
  0xe2   :  { %v144_v40 = vpack.c.bf16 %v138_v37, %v137_v36 }
  0xe3   :  { %v143_v41 = vpack.c.bf16 %v136_v39, %v135_v38  ;;  %v384_v35 = vrot.slane %v379_v33, %v383_v31 }
  0xe5   :  { %430 = vmatprep.subr.bf16.mxu1 %v143_v41 }
  0xe6   :  { %431 = vmatpush3.bf16.msra.mxu1 %v143_v41 }
  0xe7   :  { %432 = vmatprep.subr.bf16.mxu1 %v144_v40 }
  0xea   :  { %433 = vmatpush3.bf16.msra.mxu1 %v144_v40 }
  0xed   :  { %435 = vmatmul.mubr.msk.bf16.vlgmr.msra.gmra.mrb[0].mxu1 %vm179_vm2, %v454_v42 }
 0x1c0   :  { %v436_v47 = vpop.f32.mrb[0].mxu1 }
 0x1c1   :  { %v229_v48 = vadd.f32 %v436_v47, %v162_v46  ;;  %v220_v49 = vpop.f32.mrb[1].mxu1 }
 0x1c2   :  { %v221_v51 = vadd.f32 %v220_v49, %v152_v44  ;;  %v437_v52 = vpop.f32.mrb[2].mxu1 }
 0x1c3   :  { %v232_v53 = vadd.f32 %v437_v52, %v167_v50  ;;  %v223_v54 = vpop.f32.mrb[3].mxu1  ;;  %v237_v56 = vmax.f32 %v229_v48, 0.0 }
 0x1c4   :  { %v224_v55 = vadd.f32 %v223_v54, %v157_v45  ;;  %v235_v58 = vmax.f32 %v221_v51, 0.0 }
 0x1c5   :  { %v238_v57 = vmax.f32 %v232_v53, 0.0 }
 0x1c6   :  { %v236_v59 = vmax.f32 %v224_v55, 0.0 }
 0x1c7   :  { %v244_v60 = vpack.c.bf16 %v238_v57, %v237_v56 }
 0x1c8   :  { %v243_v61 = vpack.c.bf16 %v236_v59, %v235_v58 }
 0x1ca   :  { %438 = vmatprep.subr.bf16.mxu0 %v243_v61 }
 0x1cb   :  { %439 = vmatpush3.bf16.msra.mxu0 %v243_v61 }
 0x1cc   :  { %440 = vmatprep.subr.bf16.mxu0 %v244_v60 }
 0x1cf   :  { %441 = vmatpush3.bf16.msra.mxu0 %v244_v60 }
 0x1d2   :  { %443 = vmatmul.mubr.msk.bf16.vlgmr.msra.gmra.mrb[4].mxu0 %vm179_vm2, %v456_v62 }
 0x2a5   :  { %v444_v3 = vpop.f32.mrb[4].mxu0 }
 0x2a6   :  { %v319_v4 = vpop.f32.mrb[5].mxu0  ;;  %v328_v5 = vadd.f32 %v444_v3, %v262_v1 }
 0x2a7   :  { %v320_v6 = vadd.f32 %v319_v4, %v252_v63  ;;  %v445_v7 = vpop.f32.mrb[6].mxu0 }
 0x2a8   :  { %v322_v9 = vpop.f32.mrb[7].mxu0  ;;  %v331_v11 = vadd.f32 %v445_v7, %v267_v2  ;;  %v336_v14 = vmax.f32 %v328_v5, 0.0 }
 0x2a9   :  { %v334_v10 = vmax.f32 %v320_v6, 0.0  ;;  %v323_v12 = vadd.f32 %v322_v9, %v257_v0 }
 0x2aa   :  { %v337_v17 = vmax.f32 %v331_v11, 0.0  ;;  %v364_v20 = vmul.f32 %v355_v19, %v336_v14 }
 0x2ab   :  { %v335_v15 = vmax.f32 %v323_v12, 0.0  ;;  %v362_v16 = vmul.f32 %v345_v8, %v334_v10 }
 0x2ac   :  { %v365_v23 = vmul.f32 %v360_v22, %v337_v17 }
 0x2ad   :  { %v363_v18 = vmul.f32 %v350_v13, %v335_v15 }
 0x2af   :  { %v366_v21 = vadd.f32 %v363_v18, %v362_v16 }
 0x2b1   :  { %v367_v24 = vadd.f32 %v366_v21, %v364_v20 }
 0x2b3   :  { %v368_v26 = vadd.f32 %v367_v24, %v365_v23 }
 0x2b5   :  { %v369_v27 = vrot.slane %v368_v26, 4 }
 0x2b7   :  { %v370_v29 = vadd.f32 %v369_v27, %v368_v26 }
 0x2b9   :  { %v371_v30 = vrot.slane %v370_v29, 2 }
 0x2bb   :  { %v372_v32 = vadd.f32 %v371_v30, %v370_v29 }
 0x2bd   :  { %v373_v34 = vrot.slane %v372_v32, 1 }
 0x2bf   :  { %v374_v36 = vadd.f32 %v373_v34, %v372_v32 }
 0x2c1   :  { %v385_v37 = vadd.f32 %v384_v35, %v374_v36 }
 0x2c3   :  { %386 = vst [vmem:[#allocation3] sm:$0x1] %v385_v37 }
 0x2c4   :  { %468 = shalt.err (!%p465_p4)
}
 0x2c5   :  { %s469_s2 = scalar_lea.hbm %s630_s9, 16 }
 0x2c6   :  { %p470_p5 = scmp.ne.s32.totalorder %s630_s9, %s469_s2  ;;  %p473_p6 = scmp.lt.u32.totalorder %s469_s2, %s630_s9 }
 0x2c8   :  { %p475_p7 = pnand %p473_p6, %p470_p5 }
 0x2ca   :  { %478 = shalt.err (!%p475_p7)
}
 0x2cb   :  { %396 = dma.vmem_to_hbm [thread:$0]  %s394_s25, 16, %s630_s9, [#allocation4]  }
 0x2cc   :  { %479 = dma.done.wait [#allocation4], 16  }
 0x2cd   :  { %480 = vsyncadd [#allocation4], 4294967280 }
 0x2ce   :  { %400 = vsyncpa [#allocation4], 1 }

</bundles_post_ra>
